<compile_context>
chip_gen: v5e
topology: v5e:2x2
jax: 0.10.0
libtpu: 0.0.40
codegen_flags: <defaults>
</compile_context>

<pallas_src>
import math

import jax
import jax.numpy as jnp
from jax.experimental import pallas as pl
from jax.experimental.pallas import tpu as pltpu


def _fusion_gate_kernel(wa_ref, wb_ref, bias_ref, a_ref, b_ref, o_ref):
    # wa_ref / wb_ref: (H, H) = W[:, :H].T / W[:, H:].T, resident in VMEM.
    # bias_ref: (1, H) f32.  a_ref / b_ref / o_ref: (TM, H) row tiles.
    a = a_ref[...]
    b = b_ref[...]
    mxu_dtype = wa_ref.dtype
    logits = (
        jnp.dot(a.astype(mxu_dtype), wa_ref[...],
                preferred_element_type=jnp.float32)
        + jnp.dot(b.astype(mxu_dtype), wb_ref[...],
                  preferred_element_type=jnp.float32)
        + bias_ref[...]
    )
    coef = jax.nn.sigmoid(logits).astype(a.dtype)        # EUP; blend in native dtype
    # coef*a + (1-coef)*b  ==  b + coef*(a - b)   (one fewer VPU multiply)
    o_ref[...] = (b + coef * (a - b)).astype(o_ref.dtype)


def prepare_fusion_gate_params(weight, bias, mxu_dtype=jnp.bfloat16):
    """Split/transpose the torch nn.Linear(2H->H) params once, outside the hot path.

    weight: (hid, 2*hid) (torch Linear layout); bias: (hid,).
    Returns (wa, wb, bias2) with wa = W[:, :H].T, wb = W[:, H:].T cast to
    `mxu_dtype` (bf16 by default: the MXU's native input width) and bias in f32.
    Note: casting f32 weights to bf16 matches what DEFAULT-precision MXU matmul
    does anyway; accumulation stays f32 inside the kernel.
    """
    hid = weight.shape[0]
    assert weight.shape == (hid, 2 * hid)
    if mxu_dtype is None:
        mxu_dtype = weight.dtype
    wa = weight[:, :hid].T.astype(mxu_dtype)   # a @ wa == a @ W_a^T
    wb = weight[:, hid:].T.astype(mxu_dtype)   # b @ wb == b @ W_b^T
    bias2 = bias.reshape(1, hid).astype(jnp.float32)
    return wa, wb, bias2


def _vmem_capacity_bytes(default=64 * 1024 * 1024):
    try:
        info = pltpu.get_tpu_info()
        return int(getattr(info, "vmem_capacity_bytes", default))
    except Exception:
        return default


def _align_up(x, m):
    return -(-x // m) * m


def fusion_gate(wa, wb, bias2, a, b, *, max_row_tile=1024):
    """Apply the fusion gate; wa/wb/bias2 come from prepare_fusion_gate_params."""
    hid = wa.shape[0]
    assert wa.shape == (hid, hid) and wb.shape == (hid, hid)
    assert bias2.shape == (1, hid)
    assert a.shape == b.shape and a.shape[-1] == hid

    dtype = a.dtype
    act_bytes = jnp.dtype(dtype).itemsize
    w_bytes = jnp.dtype(wa.dtype).itemsize
    orig_shape = a.shape
    rows = math.prod(orig_shape[:-1]) if len(orig_shape) > 1 else 1

    # --- VMEM accounting: resident weights/bias are a single copy; row tiles are
    #     double-buffered by the pipeline; in-kernel temporaries counted explicitly.
    weight_bytes = 2 * hid * hid * w_bytes + hid * 4
    per_row_bytes = hid * (
        3 * 2 * act_bytes      # a, b, out row tiles (double-buffered)
        + 4                    # f32 logits temporary
        + 2 * act_bytes        # coef and (a - b) temporaries
        + 2 * w_bytes          # MXU-dtype casts of a and b
    )
    vmem_cap = _vmem_capacity_bytes()
    vmem_budget = max(min((vmem_cap * 3) // 4, 100 * 1024 * 1024), 32 * 1024 * 1024)
    slack = 2 * 1024 * 1024
    avail = vmem_budget - weight_bytes - slack

    # --- row tile: biggest sublane-aligned tile within budget; keep >= 2 grid
    #     steps when possible (v7x two-TensorCore sharding); round large tiles to
    #     a multiple of 256 (full-width MXU passes on v6e/v7x).
    tm = max(8, min(max_row_tile, avail // per_row_bytes) // 8 * 8)
    tm = min(tm, _align_up(rows, 8))
    if rows > 8:
        tm = min(tm, max(8, _align_up((rows + 1) // 2, 8)))
    if tm >= 256:
        tm = (tm // 256) * 256
    if tm > rows:
        tm = rows              # full-extent block for tiny row counts

    needed = weight_bytes + per_row_bytes * tm + slack
    vmem_guard = max(vmem_cap - 4 * 1024 * 1024, 32 * 1024 * 1024)
    if needed > vmem_guard:
        # TODO(synk): stream W in (hid, tn) output-column tiles over a second grid
        # axis once the resident-weight path no longer fits (very large hid).
        raise ValueError(
            f"fusion_gate: hid={hid} needs ~{needed >> 20} MiB of VMEM "
            f"(> {vmem_guard >> 20} MiB usable); weight streaming not implemented."
        )
    # Never clamp below `needed` (tm was already sized to the budget).
    vmem_limit = int(max(min(needed + slack, vmem_guard), 32 * 1024 * 1024))

    a2 = a.reshape(rows, hid)
    b2 = b.reshape(rows, hid)
    grid = (pl.cdiv(rows, tm),)     # partial last block is masked by Pallas

    out2 = pl.pallas_call(
        _fusion_gate_kernel,
        out_shape=jax.ShapeDtypeStruct((rows, hid), dtype),
        grid_spec=pltpu.PrefetchScalarGridSpec(
            num_scalar_prefetch=0,
            grid=grid,
            in_specs=[
                pl.BlockSpec(memory_space=pltpu.MemorySpace.VMEM),  # W_a^T resident
                pl.BlockSpec(memory_space=pltpu.MemorySpace.VMEM),  # W_b^T resident
                pl.BlockSpec(memory_space=pltpu.MemorySpace.VMEM),  # bias resident
                pl.BlockSpec((tm, hid), lambda i: (i, 0)),          # a row tile
                pl.BlockSpec((tm, hid), lambda i: (i, 0)),          # b row tile
            ],
            out_specs=pl.BlockSpec((tm, hid), lambda i: (i, 0)),
        ),
        compiler_params=pltpu.CompilerParams(
            dimension_semantics=("parallel",),
            vmem_limit_bytes=vmem_limit,
        ),
    )(wa, wb, bias2, a2, b2)

    return out2.reshape(orig_shape)


if __name__ == "__main__":
    key = jax.random.PRNGKey(0)
    k_w, k_bias, k_a, k_b = jax.random.split(key, 4)

    batch, seq, hid = 2, 8, 32

    # nn.Linear(hid*2, hid) parameters (uniform init like torch's default).
    bound = 1.0 / math.sqrt(2 * hid)
    weight = jax.random.uniform(k_w, (hid, 2 * hid), jnp.float32, -bound, bound)
    bias = jax.random.uniform(k_bias, (hid,), jnp.float32, -bound, bound)

    a = jax.random.normal(k_a, (batch, seq, hid), dtype=jnp.float32)
    b = jax.random.normal(k_b, (batch, seq, hid), dtype=jnp.float32)

    # Parameter split/transpose hoisted out of the per-call hot path (done once).
    wa, wb, bias2 = prepare_fusion_gate_params(weight, bias, mxu_dtype=jnp.bfloat16)

    out = fusion_gate(wa, wb, bias2, a, b)
    out = jax.block_until_ready(out)
    assert out.shape == a.shape

    # Exact f32 reference matching the PyTorch forward (loose tolerance covers the
    # kernel's single-pass bf16 MXU inputs; accumulation stays f32).
    concat = jnp.concatenate([a, b], axis=-1)
    logits = jnp.dot(concat, weight.T, precision=jax.lax.Precision.HIGHEST) + bias
    coef = jax.nn.sigmoid(logits)
    ref = coef * a + (1.0 - coef) * b
    assert jnp.allclose(out, ref, atol=2e-2, rtol=2e-2), float(jnp.max(jnp.abs(out - ref)))

    # Tight structural check against a reference that uses the same bf16 MXU inputs.
    wbf = weight.astype(jnp.bfloat16)
    logits_mxu = (
        jnp.dot(a.astype(jnp.bfloat16), wbf[:, :hid].T, preferred_element_type=jnp.float32)
        + jnp.dot(b.astype(jnp.bfloat16), wbf[:, hid:].T, preferred_element_type=jnp.float32)
        + bias
    )
    coef_mxu = jax.nn.sigmoid(logits_mxu)
    ref_mxu = coef_mxu * a + (1.0 - coef_mxu) * b
    assert jnp.allclose(out, ref_mxu, atol=5e-3, rtol=5e-3), float(
        jnp.max(jnp.abs(out - ref_mxu)))

    print("KERNEL_OK")
</pallas_src>

<mosaic_0001>
module attributes {stable_mosaic.version = 11 : i64} {
  func.func @_fusion_gate_kernel(%arg0: i32, %arg1: memref<32x32xbf16, #tpu.memory_space<vmem>>, %arg2: memref<32x32xbf16, #tpu.memory_space<vmem>>, %arg3: memref<1x32xf32, #tpu.memory_space<vmem>>, %arg4: memref<8x32xf32, #tpu.memory_space<vmem>>, %arg5: memref<8x32xf32, #tpu.memory_space<vmem>>, %arg6: memref<8x32xf32, #tpu.memory_space<vmem>>) attributes {dimension_semantics = [#tpu.dimension_semantics<parallel>], iteration_bounds = array<i64: 2>, scalar_prefetch = 0 : i64, scratch_operands = 0 : i64, tpu.core_type = #tpu.core_type<tc>, window_params = [{pipeline_mode = #tpu.pipeline_mode<synchronous>, transform_indices = @transform_0, window_bounds = array<i64: 32, 32>}, {pipeline_mode = #tpu.pipeline_mode<synchronous>, transform_indices = @transform_1, window_bounds = array<i64: 32, 32>}, {pipeline_mode = #tpu.pipeline_mode<synchronous>, transform_indices = @transform_2, window_bounds = array<i64: 1, 32>}, {transform_indices = @transform_3, window_bounds = array<i64: 8, 32>}, {transform_indices = @transform_4, window_bounds = array<i64: 8, 32>}, {transform_indices = @transform_5, window_bounds = array<i64: 8, 32>}]} {
    %c0 = arith.constant 0 : index
    %c0_0 = arith.constant 0 : index
    %0 = vector.load %arg4[%c0, %c0_0] : memref<8x32xf32, #tpu.memory_space<vmem>>, vector<8x32xf32>
    %c0_1 = arith.constant 0 : index
    %c0_2 = arith.constant 0 : index
    %1 = vector.load %arg5[%c0_1, %c0_2] : memref<8x32xf32, #tpu.memory_space<vmem>>, vector<8x32xf32>
    %2 = arith.truncf %0 : vector<8x32xf32> to vector<8x32xbf16>
    %c0_3 = arith.constant 0 : index
    %c0_4 = arith.constant 0 : index
    %3 = vector.load %arg1[%c0_3, %c0_4] : memref<32x32xbf16, #tpu.memory_space<vmem>>, vector<32x32xbf16>
    %cst = arith.constant dense<0.000000e+00> : vector<8x32xf32>
    %4 = tpu.matmul %2, %3, %cst {dimension_numbers = #tpu.dot_dimension_numbers<[1], [0], [0], [1], [0, 0, 1, 1], [], []>} : vector<8x32xbf16>, vector<32x32xbf16>, vector<8x32xf32> -> vector<8x32xf32>
    %5 = arith.truncf %1 : vector<8x32xf32> to vector<8x32xbf16>
    %c0_5 = arith.constant 0 : index
    %c0_6 = arith.constant 0 : index
    %6 = vector.load %arg2[%c0_5, %c0_6] : memref<32x32xbf16, #tpu.memory_space<vmem>>, vector<32x32xbf16>
    %cst_7 = arith.constant dense<0.000000e+00> : vector<8x32xf32>
    %7 = tpu.matmul %5, %6, %cst_7 {dimension_numbers = #tpu.dot_dimension_numbers<[1], [0], [0], [1], [0, 0, 1, 1], [], []>} : vector<8x32xbf16>, vector<32x32xbf16>, vector<8x32xf32> -> vector<8x32xf32>
    %8 = arith.addf %4, %7 : vector<8x32xf32>
    %c0_8 = arith.constant 0 : index
    %c0_9 = arith.constant 0 : index
    %9 = vector.load %arg3[%c0_8, %c0_9] : memref<1x32xf32, #tpu.memory_space<vmem>>, vector<1x32xf32>
    %10 = vector.broadcast %9 : vector<1x32xf32> to vector<8x32xf32>
    %11 = arith.addf %8, %10 : vector<8x32xf32>
    %12 = arith.negf %11 : vector<8x32xf32>
    %13 = math.exp %12 : vector<8x32xf32>
    %cst_10 = arith.constant 1.000000e+00 : f32
    %14 = vector.broadcast %cst_10 : f32 to vector<8x32xf32>
    %15 = arith.addf %14, %13 : vector<8x32xf32>
    %16 = arith.divf %14, %15 : vector<8x32xf32>
    %17 = arith.subf %0, %1 : vector<8x32xf32>
    %18 = arith.mulf %16, %17 : vector<8x32xf32>
    %19 = arith.addf %1, %18 : vector<8x32xf32>
    %c0_11 = arith.constant 0 : index
    %c0_12 = arith.constant 0 : index
    %20 = vector.load %arg6[%c0_11, %c0_12] : memref<8x32xf32, #tpu.memory_space<vmem>>, vector<8x32xf32>
    tpu.vector_store %arg6[%c0_11, %c0_12], %19 {strides = array<i32>} : memref<8x32xf32, #tpu.memory_space<vmem>>, vector<8x32xf32>,
    return
  }
  func.func @transform_0(%arg0: i32) -> (i32, i32) {
    %c0_i32 = arith.constant 0 : i32
    %c0_i32_0 = arith.constant 0 : i32
    %c0_i32_1 = arith.constant 0 : i32
    return %c0_i32, %c0_i32_0 : i32, i32
  }
  func.func @transform_1(%arg0: i32) -> (i32, i32) {
    %c0_i32 = arith.constant 0 : i32
    %c0_i32_0 = arith.constant 0 : i32
    %c0_i32_1 = arith.constant 0 : i32
    return %c0_i32, %c0_i32_0 : i32, i32
  }
  func.func @transform_2(%arg0: i32) -> (i32, i32) {
    %c0_i32 = arith.constant 0 : i32
    %c0_i32_0 = arith.constant 0 : i32
    %c0_i32_1 = arith.constant 0 : i32
    return %c0_i32, %c0_i32_0 : i32, i32
  }
  func.func @transform_3(%arg0: i32) -> (i32, i32) {
    %c0_i32 = arith.constant 0 : i32
    %c0_i32_0 = arith.constant 0 : i32
    return %arg0, %c0_i32 : i32, i32
  }
  func.func @transform_4(%arg0: i32) -> (i32, i32) {
    %c0_i32 = arith.constant 0 : i32
    %c0_i32_0 = arith.constant 0 : i32
    return %arg0, %c0_i32 : i32, i32
  }
  func.func @transform_5(%arg0: i32) -> (i32, i32) {
    %c0_i32 = arith.constant 0 : i32
    %c0_i32_0 = arith.constant 0 : i32
    return %arg0, %c0_i32 : i32, i32
  }
}

</mosaic_0001>

<bundles_post_ra>
// kernel: tpu_custom_call.1
= control target key start
LH: loop header
LB: loop body
LE: loop exit
PB: predicated region body
PF: predicated region fallthrough
CT: control target
= control target key end

     0   :  { %s1081_s0 = inlined_call_operand.hbm [shape: bf16[32,32], index: 0, kind: input, shape index: {}]   ;;  %s1082_s1 = inlined_call_operand.hbm [shape: bf16[32,32], index: 1, kind: input, shape index: {}]   ;;  %s1083_s2 = inlined_call_operand.vmem [shape: f32[1,32], index: 2, kind: input, shape index: {}]   ;;  %s1084_s3 = inlined_call_operand.hbm [shape: f32[16,32], index: 3, kind: input, shape index: {}]   ;;  %s1085_s4 = inlined_call_operand.hbm [shape: f32[16,32], index: 4, kind: input, shape index: {}]   ;;  %s1086_s5 = inlined_call_operand.hbm [shape: f32[16,32], index: 5, kind: output, shape index: {}]  }
   0x1   :  { %1091 = sst [smem:[#allocation16_spill]] %s1081_s0 }
   0x2   :  { %1092 = sst [smem:[#allocation17_spill]] %s1082_s1 }
   0x3   :  { %1093 = sst [smem:[#allocation18_spill]] %s1084_s3 }
   0x4   :  { %10 = vsyncpa [#allocation3], 0 }
   0x5   :  { %11 = vsyncpa [#allocation6], 0 }
   0x6   :  { %12 = vsyncpa [#allocation4], 0 }
   0x7   :  { %14 = vsyncpa [#allocation4 + $0x1], 0  ;;  %s883_s18 = smov 0   ;;  %s885_s19 = smov 0  }
   0x8   :  { %s887_s20 = smov 0   ;;  %s889_s21 = smov 0  }
   0x9 LB: > { %1094 = sst [smem:[#allocation14_spill]] %s843_s20  ;;  %s904_s22 = sadd.s32 4294967295, %s847_s21   ;;  %s847_s21 = sphi %s889_s21, %s1117_s21   ;;  %s843_s20 = sphi %s887_s20, %s1116_s20   ;;  %s839_s19 = sphi %s885_s19, %s1115_s19   ;;  %s835_s18 = sphi %s883_s18, %s1114_s18  }
   0xa   : > { %s532_s23 = sadd.s32 4294967294, %s847_s21   ;;  %p103_p0 = scmp.ne.s32.totalorder %s839_s19, %s835_s18 }
   0xb   : > { %p1089_p1 = scmp.eq.s32.totalorder %s904_s22, 0  ;;  %p153_p2 = scmp.eq.s32.totalorder %s904_s22, 1 }
   0xc   : > { %p159_p3 = scmp.eq.s32.totalorder %s532_s23, 1  ;;  %p533_p5 = scmp.ge.s32.totalorder %s847_s21, 1 }
   0xd   : > { %p913_p4 = por %p1089_p1, %p103_p0  ;;  %p166_p7 = scmp.lt.s32.totalorder %s847_s21, 3 }
   0xe   : > { %p918_p6 = por %p159_p3, %p103_p0  ;;  %s1097_s0 = sld [smem:[#allocation16_spill]] }
   0xf   : > { %p926_p8 = pnand %p533_p5, %p166_p7  ;;  %s849_s30 = smov [#allocation2]  }
  0x10   : > { %s179_s6 = sshll.u32 %s849_s30, 4  ;;  %s940_s8 = sadd.s32 1, %s847_s21   ;;  %s180_s6 = int_to_ptr.vmem [resolvable:$true] %s179_s6 }
  0x11   : > { %p588_p9 = pneg %p926_p8  ;;  %s1087_s9 = smov 64  }
  0x12   : > { %s1088_s10 = smov 4   ;;  %s87_s11 = ssub.s32 %s847_s21, %s940_s8 }
  0x13   : > { %p934_p10 = pnand %p588_p9, %p1089_p1  ;;  %s90_s12 = sadd.s32 1, %s843_s20 }
  0x14   : > { %s177_s28 = sshll.u32 %s1097_s0, 4  ;;  %p88_p12 = scmp.eq.s32.totalorder %s87_s11, 0  ;;  %s178_s28 = int_to_ptr.hbm [resolvable:$true] %s177_s28 }
  0x15   : > { %591 = dma.hbm_to_vmem [thread:$0]  (!%p934_p10), %s178_s28, 256, %s180_s6, [#allocation3], %s1087_s9, %s1087_s9, %s1088_s10  }
  0x16   : > { %p97_p13 = scmp.ne.s32.totalorder %s843_s20, %s839_s19  ;;  %p98_p0 = scmp.eq.s32.totalorder %s847_s21, 0 }
  0x17   : > { %p608_p3 = scmp.lt.s32.totalorder %s847_s21, 2  ;;  %s210_s15 = sand.u32 1, %s847_s21  }
  0x18   : > { %s955_s13 = scalar_select %p88_p12, %s843_s20, %s90_s12  }
  0x19   : > { %p99_p5 = por %p98_p0, %p97_p13  ;;  %p959_p7 = por %p153_p2, %p97_p13 }
  0x1a   : > { %1100 = sst [smem:[#allocation15_spill]] %s955_s13  ;;  %s212_s16 = sand.u32 1, %s843_s20  }
  0x1b   : > { %s965_s17 = sshll.u32 %s212_s16, 3  ;;  %s538_s23 = sshll.u32 %s847_s21, 3 }
  0x1c   : > { %s1102_s3 = sld [smem:[#allocation18_spill]]  ;;  %s214_s30 = scalar_lea.vmem [#allocation7], %s965_s17 }
  0x1d   : > { %s222_s6 = sshll.u32 %s214_s30, 4  ;;  %p974_p2 = pnand %p608_p3, %p99_p5  ;;  %s223_s6 = int_to_ptr.vmem [resolvable:$true] %s222_s6 }
  0x1e   : > { %s1104_s1 = sld [smem:[#allocation17_spill]]  ;;  %s981_s0 = scalar_lea.sflag [#allocation3], %s210_s15 }
  0x1f   : > { %p687_p12 = pneg %p974_p2 }
  0x22   : > { %s218_s28 = scalar_lea.hbm %s1102_s3, %s538_s23  ;;  %s690_s9 = scalar_lea.hbm %s1102_s3, 16 }
  0x23   : > { %s220_s11 = sshll.u32 %s218_s28, 4  ;;  %s221_s11 = int_to_ptr.hbm [resolvable:$true] %s220_s11 }
  0x24   : > { %s191_s16 = sshll.u32 %s1104_s1, 4  ;;  %s683_s26 = sshra.s32 %s221_s11, 4  ;;  %s192_s16 = int_to_ptr.hbm [resolvable:$true] %s191_s16  ;;  %s684_s26 = int_to_ptr.hbm [resolvable:$true] %s683_s26 }
  0x25   : > { %s685_s27 = scalar_lea.hbm %s684_s26, 8  ;;  %p691_p3 = scmp.lt.s32.totalorder %s684_s26, %s1102_s3 }
  0x26   : > { %p686_p9 = scmp.ne.s32.totalorder %s684_s26, %s685_s27  ;;  %p692_p5 = scmp.lt.s32.totalorder %s690_s9, %s685_s27 }
  0x28   : > { %p688_p13 = pnand %p687_p12, %p686_p9  ;;  %p693_p11 = por %p692_p5, %p691_p3 }
  0x2a   : > { %p689_p0 = pneg %p688_p13 }
  0x2c   : > { %p694_p1 = pnand %p693_p11, %p689_p0 }
  0x2e   : > { %697 = shalt.err (!%p694_p1)
}
  0x2f   : > { %598 = dma.hbm_to_vmem [thread:$0]  (!%p974_p2), %s221_s11, 128, %s223_s6, %s981_s0  }
  0x30   : > { %s852_s15 = smov [#allocation5]   ;;  %s237_s20 = scalar_lea.hbm %s1085_s4, %s538_s23 }
  0x31   : > { %s193_s1 = sshll.u32 %s852_s15, 4  ;;  %s1105_s13 = smov 4   ;;  %s194_s1 = int_to_ptr.vmem [resolvable:$true] %s193_s1 }
  0x32   : > { %s1106_s26 = smov 64   ;;  %s239_s27 = sshll.u32 %s237_s20, 4  ;;  %s240_s27 = int_to_ptr.hbm [resolvable:$true] %s239_s27 }
  0x33   : > { %594 = dma.hbm_to_vmem [thread:$0]  (!%p934_p10), %s192_s16, 256, %s194_s1, [#allocation6], %s1106_s26, %s1106_s26, %s1105_s13  }
  0x34   : > { %s233_s9 = scalar_lea.vmem [#allocation8], %s965_s17  ;;  %s743_s3 = sshra.s32 %s240_s27, 4  ;;  %s744_s3 = int_to_ptr.hbm [resolvable:$true] %s743_s3 }
  0x35   : > { %s241_s10 = sshll.u32 %s233_s9, 4  ;;  %s745_s6 = scalar_lea.hbm %s744_s3, 8  ;;  %s242_s10 = int_to_ptr.vmem [resolvable:$true] %s241_s10 }
  0x36   : > { %p746_p1 = scmp.ne.s32.totalorder %s744_s3, %s745_s6  ;;  %s750_s7 = scalar_lea.hbm %s1085_s4, 16 }
  0x37   : > { %p751_p10 = scmp.lt.s32.totalorder %s744_s3, %s1085_s4  ;;  %p752_p13 = scmp.lt.s32.totalorder %s750_s7, %s745_s6 }
  0x38   : > { %p748_p11 = pnand %p746_p1, %p687_p12 }
  0x39   : > { %p753_p0 = por %p752_p13, %p751_p10 }
  0x3a   : > { %p749_p9 = pneg %p748_p11 }
  0x3c   : > { %p754_p3 = pnand %p753_p0, %p749_p9 }
  0x3e   : > { %757 = shalt.err (!%p754_p3)
}
  0x3f   : > { %601 = dma.hbm_to_vmem [thread:$0]  (!%p974_p2), %s240_s27, 128, %s242_s10, %s981_s0  }
  0x40   : > { %250 = sbr.rel (%p926_p8) target bundleno = 251 (0xfb), region = 40  ;;  %p1107_p12 = scmp.eq.s32.totalorder (!%p926_p8), %s904_s22, 0 }
  0x45   : > { %818 = dma.done.wait (%p1107_p12), [#allocation3], 256   ;;  %p1108_p5 = pmov %p1107_p12 }
  0x47   : > { %820 = vsyncadd (%p1108_p5), [#allocation3], 4294967040  ;;  %p1109_p1 = pmov %p1108_p5 }
  0x49   : > { %822 = dma.done.wait (%p1109_p1), [#allocation6], 256   ;;  %p1110_p11 = pmov %p1109_p1 }
  0x4a   : > { %s262_s0 = sand.u32 1, %s904_s22   ;;  %s264_s1 = sand.u32 1, %s839_s19  }
  0x4b   : > { %824 = vsyncadd (%p1110_p11), [#allocation6], 4294967040  ;;  %s1032_s3 = sshll.u32 %s264_s1, 3  ;;  %s263_s20 = scalar_lea.sflag [#allocation3], %s262_s0 }
  0x4c   : > { %s266_s29 = scalar_lea.vmem [#allocation7], %s1032_s3 }
  0x4d   : > { %826 = dma.done.wait (%p913_p4), %s263_s20, 256  }
  0x4e   : > { %828 = vsyncadd (%p913_p4), %s263_s20, 4294967040  ;;  %v573_v0 = vld [vmem:[#allocation5 + $0x8] sm:$0xff]  ;;  %v571_v1 = vld [vmem:[#allocation2 + $0x8] sm:$0xff]  ;;  %s276_s17 = scalar_lea.vmem [#allocation8], %s1032_s3  ;;  %vm334_vm0 = vcmask 261120   ;;  %s567_s16 = sshll.u32 %s904_s22, 3 }
  0x4f   : > { %v572_v2 = vld [vmem:[#allocation5] sm:$0xff]  ;;  %v570_v3 = vld [vmem:[#allocation2] sm:$0xff]  ;;  %344 = vmatpush.bf16.msra.mxu0 %v573_v0  ;;  %372 = vmatpush.bf16.msra.mxu1 %v571_v1  ;;  %s418_s26 = scalar_lea.hbm %s1086_s5, %s567_s16  ;;  %s308_s27 = scalar_lea.vmem [#allocation9], %s1032_s3 }
  0x50   : > { %v311_v4 = vld [vmem:[%s276_s17] sm:$0xff]  ;;  %v310_v5 = vld [vmem:[%s266_s29] sm:$0xff]  ;;  %s420_s9 = sshll.u32 %s308_s27, 4  ;;  %s422_s22 = sshll.u32 %s418_s26, 4  ;;  %s421_s9 = int_to_ptr.vmem [resolvable:$true] %s420_s9  ;;  %s423_s22 = int_to_ptr.hbm [resolvable:$true] %s422_s22 }
  0x51   : > { %v317_v6 = vpack.c.bf16 %v311_v4, %v311_v4  ;;  %v312_v7 = vpack.c.bf16 %v310_v5, %v310_v5  ;;  %v648_v8 = vld [vmem:[%s1083_s2] ss:$0 sm:$0xff]  ;;  %v403_v24 = vsub.f32 %v310_v5, %v311_v4  ;;  %s408_s10 = scalar_lea.sflag [#allocation4], %s264_s1  ;;  %s787_s6 = sshra.s32 %s423_s22, 4  ;;  %s788_s6 = int_to_ptr.hbm [resolvable:$true] %s787_s6 }
  0x52   : > { %s789_s11 = scalar_lea.hbm %s788_s6, 8  ;;  %s793_s15 = scalar_lea.hbm %s1086_s5, 16 }
  0x53   : > { %345 = vmatpush.bf16.msra.mxu0 %v572_v2  ;;  %373 = vmatpush.bf16.msra.mxu1 %v570_v3  ;;  %p790_p4 = scmp.ne.s32.totalorder %s788_s6, %s789_s11  ;;  %p794_p9 = scmp.lt.s32.totalorder %s788_s6, %s1086_s5 }
  0x54   : > { %p795_p10 = scmp.lt.s32.totalorder %s793_s15, %s789_s11 }
  0x55   : > { %p791_p8 = pnand %p790_p4, %p959_p7 }
  0x56   : > { %555 = vmatmul.msk.bf16.vlgmr.msra.gmra.mxu0 %vm334_vm0, %v317_v6  ;;  %564 = vmatmul.msk.bf16.vlgmr.msra.gmra.mxu1 %vm334_vm0, %v312_v7  ;;  %p796_p13 = por %p795_p10, %p794_p9 }
  0x57   : > { %p792_p2 = pneg %p791_p8 }
  0x59   : > { %p797_p0 = pnand %p796_p13, %p792_p2 }
  0xd3   : > { %v347_v9 = vpop.f32.mrf.mxu0  ;;  %v375_v10 = vpop.f32.mrf.mxu1 }
  0xd4   : > { %v376_v11 = vadd.f32 %v375_v10, %v347_v9 }
  0xd6   : > { %v383_v12 = vadd.f32 %v648_v8, %v376_v11 }
  0xd8   : > { %v565_v13 = vmul.f32 -1.442695, %v383_v12 }
  0xda   : > { %649 = vpow2.f32 %v565_v13 }
  0xdb   : > { %v349_v14 = vpop.f32.mrf.mxu0  ;;  %v377_v15 = vpop.f32.mrf.mxu1 }
  0xe0   : > { %v650_v16 = vpop.eup %649 }
  0xe1   : > { %v387_v17 = vadd.f32 1.0, %v650_v16 }
  0xe3   : > { %651 = vrcp.f32 %v387_v17  ;;  %v399_v21 = vand.u32 2147483648, %v387_v17  ;;  %v397_v23 = vand.u32 2147483647, %v387_v17  ;;  %vm393_vm2 = vweird.f32 %v387_v17 }
  0xe5   : > { %v400_v26 = vor.u32 1.1754944e-38, %v399_v21  ;;  %vm398_vm4 = vcmp.eq.f32.partialorder %v397_v23, 8.507059e+37 }
  0xe9   : > { %v652_v18 = vpop.eup %651 }
  0xea   : > { %v389_v19 = vmul.f32 %v652_v18, %v387_v17  ;;  %vm394_vm1 = vweird.f32 %v652_v18 }
  0xeb   : > { %vm395_vm3 = vmor %vm393_vm2, %vm394_vm1 }
  0xec   : > { %v390_v20 = vsub.f32 1.0, %v389_v19 }
  0xee   : > { %v391_v22 = vmul.f32 %v652_v18, %v390_v20 }
  0xf0   : > { %v392_v25 = vadd.f32 %v652_v18, %v391_v22 }
  0xf2   : > { %v396_v27 = vsel %vm395_vm3, %v652_v18, %v392_v25 }
  0xf3   : > { %v401_v28 = vsel %vm398_vm4, %v400_v26, %v396_v27 }
  0xf4   : > { %v404_v29 = vmul.f32 %v403_v24, %v401_v28 }
  0xf6   : > { %v405_v30 = vadd.f32 %v404_v29, %v311_v4 }
  0xf8   : > { %406 = vst.msk [vmem:[%s308_s27] sm:$0xff] %vm334_vm0, %v405_v30 }
  0xf9   : > { %800 = shalt.err (!%p797_p0)
}
  0xfa   : > { %586 = dma.vmem_to_hbm [thread:$0]  (%p959_p7), %s421_s9, 128, %s423_s22, %s408_s10  }
  0xfb PF: > { %s434_s1 = sand.u32 1, %s835_s18   ;;  %p1111_p3 = scmp.ge.s32.totalorder %s847_s21, 2 }
  0xfc   : > { %s435_s3 = scalar_lea.sflag [#allocation4], %s434_s1 }
  0xfd   : > { %p603_p12 = pnand %p1111_p3, %p918_p6 }
  0xff   : > { %p604_p5 = pneg %p603_p12 }
 0x101   : > { %830 = dma.done.wait (%p604_p5), %s435_s3, 128  }
 0x102   : > { %832 = vsyncadd (%p604_p5), %s435_s3, 4294967168  ;;  %s1112_s20 = sld [smem:[#allocation14_spill]]  ;;  %p17_p1 = scmp.ge.s32.totalorder %s940_s8, 4  }
 0x103   : > { %s1113_s29 = sld [smem:[#allocation15_spill]]  ;;  %s1114_s18 = smov %s839_s19 }
 0x104   : > { %s1117_s21 = smov %s940_s8 }
 0x105   :  { %19 = sbr.rel (!%p17_p1) target bundleno = 9 (0x9), region = 103 }
 0x108   : > { %s1115_s19 = smov %s1112_s20 }
 0x109   : > { %s1116_s20 = smov %s1113_s29 }
 0x10a   :  { %441 = vsyncpa [#allocation3], 1 }
 0x10b   :  { %443 = vsyncpa [#allocation3 + $0x1], 1 }
 0x10c   :  { %444 = vsyncpa [#allocation6], 1 }
 0x10d   :  { %445 = vsyncpa [#allocation4], 1 }
 0x10e   :  { %447 = vsyncpa [#allocation4 + $0x1], 1 }

</bundles_post_ra>
